<compile_context>
chip_gen: v6e
topology: v6e:2x2x1
jax: 0.10.0
libtpu: 0.0.40
codegen_flags: <defaults>
</compile_context>

<pallas_src>
import jax
import jax.numpy as jnp
from jax.experimental import pallas as pl
from jax.experimental.pallas import tpu as pltpu

_TARGET_BLOCK_BYTES = 1 << 20  # ~1 MiB per block


def _shrinkage_kernel(eps_ref, x_ref, o_ref):
    # eps_ref: SMEM (1,1) fp32 scalar; x_ref/o_ref: VMEM (block_rows, lanes).
    x = x_ref[...].astype(jnp.float32)
    eps = eps_ref[0, 0]
    # soft threshold: sign(x) * max(0, |x| - eps) == x - clip(x, -eps, eps)
    o_ref[...] = (x - jnp.clip(x, -eps, eps)).astype(o_ref.dtype)


def shrinkage_activation(x, epsilon):
    """Soft-threshold x by scalar epsilon, elementwise (same shape/dtype as x)."""
    orig_shape = x.shape
    dtype = x.dtype
    flat = x.reshape(-1)
    n = flat.shape[0]
    if n == 0:
        return x

    itemsize = jnp.dtype(dtype).itemsize
    sublane = max(8, 32 // itemsize)  # 8 for f32, 16 for bf16, 32 for int8

    # Prefer a wide lane dim when it divides n exactly (no padding needed);
    # otherwise fall back to 128 with minimal padding.
    lanes = 128
    for cand in (1024, 512, 256):
        if n % cand == 0:
            lanes = cand
            break

    padded_n = pl.cdiv(n, lanes) * lanes
    if padded_n != n:
        # TODO(synk): handle the ragged tail with an in-kernel masked store to
        # avoid this extra pad/slice HBM pass on unaligned sizes.
        flat = jnp.pad(flat, (0, padded_n - n))
    rows = padded_n // lanes

    # Block rows: ~1 MiB blocks, multiple of the dtype sublane tile, and at
    # least 2 grid steps when the data allows (shard the "parallel" axis
    # across TensorCores). Tiny inputs use a full-extent block.
    target_rows = max(
        sublane, (_TARGET_BLOCK_BYTES // (lanes * itemsize)) // sublane * sublane
    )
    if rows <= sublane:
        block_rows = rows  # full extent along rows (legal even if < sublane)
    else:
        half = (rows + 1) // 2
        half = ((half + sublane - 1) // sublane) * sublane
        block_rows = min(target_rows, half)
    grid = (pl.cdiv(rows, block_rows),)

    eps_arr = jnp.asarray(epsilon, dtype=jnp.float32).reshape(1, 1)
    x2d = flat.reshape(rows, lanes)

    out2d = pl.pallas_call(
        _shrinkage_kernel,
        out_shape=jax.ShapeDtypeStruct((rows, lanes), dtype),
        grid=grid,
        in_specs=[
            pl.BlockSpec(memory_space=pltpu.MemorySpace.SMEM),    # epsilon (1,1)
            pl.BlockSpec((block_rows, lanes), lambda i: (i, 0)),  # x slab tile
        ],
        out_specs=pl.BlockSpec((block_rows, lanes), lambda i: (i, 0)),
        compiler_params=pltpu.CompilerParams(
            dimension_semantics=("parallel",),
        ),
    )(eps_arr, x2d)

    if padded_n != n:
        return out2d.reshape(-1)[:n].reshape(orig_shape)
    return out2d.reshape(orig_shape)


def _reference(x, epsilon):
    return jnp.sign(x) * jnp.maximum(jnp.zeros_like(x), jnp.abs(x) - epsilon)


if __name__ == "__main__":
    key = jax.random.PRNGKey(0)
    epsilon = 0.3

    # Primary case: NCHW conv-style input, batch=2, C=4, 16x16, float32.
    x = jax.random.normal(key, (2, 4, 16, 16), dtype=jnp.float32)
    out = jax.block_until_ready(shrinkage_activation(x, epsilon))
    ref = _reference(x, epsilon)
    assert out.shape == x.shape and out.dtype == x.dtype
    assert jnp.allclose(out, ref, atol=1e-6), "mismatch vs reference (aligned f32)"

    # Larger aligned case: exercises the multi-step grid (>= 2 blocks).
    k1, k2 = jax.random.split(key)
    xb = jax.random.normal(k1, (2, 4, 64, 64), dtype=jnp.float32)
    outb = jax.block_until_ready(shrinkage_activation(xb, epsilon))
    assert jnp.allclose(outb, _reference(xb, epsilon), atol=1e-6), "mismatch (big f32)"

    # Unaligned case: exercises the pad/slice path.
    xu = jax.random.normal(k2, (2, 3, 5, 7), dtype=jnp.float32)
    outu = jax.block_until_ready(shrinkage_activation(xu, epsilon))
    assert outu.shape == xu.shape
    assert jnp.allclose(outu, _reference(xu, epsilon), atol=1e-6), "mismatch (ragged f32)"

    print("KERNEL_OK")
</pallas_src>

<mosaic_0001>
module attributes {stable_mosaic.version = 11 : i64} {
  func.func @_shrinkage_kernel(%arg0: i32, %arg1: memref<1x1xf32, #tpu.memory_space<smem>>, %arg2: memref<2x1024xf32, #tpu.memory_space<vmem>>, %arg3: memref<2x1024xf32, #tpu.memory_space<vmem>>) attributes {dimension_semantics = [#tpu.dimension_semantics<parallel>], iteration_bounds = array<i64: 1>, scalar_prefetch = 0 : i64, scratch_operands = 0 : i64, tpu.core_type = #tpu.core_type<tc>, window_params = [{transform_indices = @transform_0, window_bounds = array<i64: 1, 1>}, {transform_indices = @transform_1, window_bounds = array<i64: 2, 1024>}, {transform_indices = @transform_2, window_bounds = array<i64: 2, 1024>}]} {
    %c0 = arith.constant 0 : index
    %c0_0 = arith.constant 0 : index
    %0 = vector.load %arg2[%c0, %c0_0] : memref<2x1024xf32, #tpu.memory_space<vmem>>, vector<2x1024xf32>
    %c0_1 = arith.constant 0 : index
    %c0_2 = arith.constant 0 : index
    %1 = memref.load %arg1[%c0_1, %c0_2] : memref<1x1xf32, #tpu.memory_space<smem>>
    %cst = arith.constant 0.000000e+00 : f32
    %2 = arith.subf %cst, %1 : f32
    %3 = vector.broadcast %2 : f32 to vector<2x1024xf32>
    %4 = arith.maximumf %3, %0 : vector<2x1024xf32>
    %5 = vector.broadcast %1 : f32 to vector<2x1024xf32>
    %6 = arith.minimumf %5, %4 : vector<2x1024xf32>
    %7 = arith.subf %0, %6 : vector<2x1024xf32>
    %c0_3 = arith.constant 0 : index
    %c0_4 = arith.constant 0 : index
    %8 = vector.load %arg3[%c0_3, %c0_4] : memref<2x1024xf32, #tpu.memory_space<vmem>>, vector<2x1024xf32>
    tpu.vector_store %arg3[%c0_3, %c0_4], %7 {strides = array<i32>} : memref<2x1024xf32, #tpu.memory_space<vmem>>, vector<2x1024xf32>,
    return
  }
  func.func @transform_0(%arg0: i32) -> (i32, i32) {
    %c0_i32 = arith.constant 0 : i32
    %c0_i32_0 = arith.constant 0 : i32
    %c0_i32_1 = arith.constant 0 : i32
    return %c0_i32, %c0_i32_0 : i32, i32
  }
  func.func @transform_1(%arg0: i32) -> (i32, i32) {
    %c0_i32 = arith.constant 0 : i32
    %c0_i32_0 = arith.constant 0 : i32
    return %arg0, %c0_i32 : i32, i32
  }
  func.func @transform_2(%arg0: i32) -> (i32, i32) {
    %c0_i32 = arith.constant 0 : i32
    %c0_i32_0 = arith.constant 0 : i32
    return %arg0, %c0_i32 : i32, i32
  }
}

</mosaic_0001>

<bundles_post_ra>
// kernel: tpu_custom_call.1
= control target key start
LH: loop header
LB: loop body
LE: loop exit
PB: predicated region body
PF: predicated region fallthrough
CT: control target
= control target key end

     0   :  { %8 = vsyncpa [#allocation4], 0  ;;  %s129_s0 = inlined_call_operand.<no memory space> [shape: f32[1,1], index: 0, kind: input, shape index: {}]   ;;  %s130_s1 = inlined_call_operand.hbm [shape: f32[2,1024], index: 1, kind: input, shape index: {}]   ;;  %s131_s2 = inlined_call_operand.hbm [shape: f32[2,1024], index: 2, kind: output, shape index: {}]  }
   0x1   :  { %9 = vsyncpa [#allocation5], 0  ;;  %s100_s9 = smov [#allocation3]  }
   0x2   :  { %s18_s10 = sshll.u32 %s100_s9, 4  ;;  %s19_s10 = int_to_ptr.vmem [resolvable:$true] %s18_s10 }
   0x3   :  { %s64_s11 = scalar_lea.vmem %s19_s10, 256  ;;  %p69_p1 = scmp.lt.s32.totalorder %s19_s10, %s19_s10 }
   0x4   :  { %p65_p0 = scmp.ne.s32.totalorder %s19_s10, %s64_s11  ;;  %p70_p2 = scmp.lt.s32.totalorder %s64_s11, %s64_s11 }
   0x6   :  { %p71_p3 = por %p70_p2, %p69_p1 }
   0x8   :  { %p72_p4 = pnand %p71_p3, %p65_p0 }
   0xa   :  { %75 = shalt.err (!%p72_p4)
}
   0xb   :  { %21 = dma.hbm_to_vmem [thread:$0]  %s130_s1, 256, %s19_s10, [#allocation4]  }
   0xc   :  { %96 = dma.done.wait [#allocation4], 256  }
   0xd   :  { %97 = vsyncadd [#allocation4], 4294967040  ;;  %s28_s16 = ssub.f32 0.0, %s129_s0  ;;  %v25_v1 = vld [vmem:[#allocation3] sm:$0xff]  ;;  %v32_v2 = vstv %s129_s0  ;;  %v26_v3 = vld [vmem:[#allocation3 + $0x8] sm:$0xff]  ;;  %s101_s19 = smov [#allocation6]  }
   0xe   :  { %s45_s20 = sshll.u32 %s101_s19, 4  ;;  %s46_s20 = int_to_ptr.vmem [resolvable:$true] %s45_s20 }
   0xf   :  { %v29_v0 = vstv %s28_s16  ;;  %s76_s1 = scalar_lea.vmem %s46_s20, 256  ;;  %p81_p6 = scmp.lt.s32.totalorder %s46_s20, %s46_s20 }
  0x10   :  { %v30_v4 = vmax.f32 %v29_v0, %v25_v1  ;;  %v31_v5 = vmax.f32 %v29_v0, %v26_v3  ;;  %p77_p5 = scmp.ne.s32.totalorder %s46_s20, %s76_s1  ;;  %p82_p7 = scmp.lt.s32.totalorder %s76_s1, %s76_s1 }
  0x12   :  { %v33_v6 = vmin.f32 %v32_v2, %v30_v4  ;;  %v34_v7 = vmin.f32 %v32_v2, %v31_v5  ;;  %p83_p8 = por %p82_p7, %p81_p6 }
  0x14   :  { %v35_v8 = vsub.f32 %v25_v1, %v33_v6  ;;  %v36_v9 = vsub.f32 %v26_v3, %v34_v7  ;;  %p84_p9 = pnand %p83_p8, %p77_p5 }
  0x16   :  { %37 = vst [vmem:[#allocation6] sm:$0xff] %v35_v8  ;;  %38 = vst [vmem:[#allocation6 + $0x8] sm:$0xff] %v36_v9 }
  0x17   :  { %87 = shalt.err (!%p84_p9)
}
  0x18   :  { %48 = dma.vmem_to_hbm [thread:$0]  %s46_s20, 256, %s131_s2, [#allocation5]  }
  0x19   :  { %98 = dma.done.wait [#allocation5], 256  }
  0x1a   :  { %99 = vsyncadd [#allocation5], 4294967040 }
  0x1b   :  { %52 = vsyncpa [#allocation4], 1 }
  0x1c   :  { %53 = vsyncpa [#allocation5], 1 }

</bundles_post_ra>
